<compile_context>
chip_gen: v5e
topology: v5e:2x2
jax: 0.10.0
libtpu: 0.0.40
codegen_flags: <defaults>
</compile_context>

<pallas_src>
import functools

import jax
import jax.numpy as jnp
from jax.experimental import pallas as pl
from jax.experimental.pallas import tpu as pltpu


IGNORE_INDEX = -100


def _ce_lse_kernel(logits_ref, tgt_ref, labels_ref, sum_ref, m_acc, s_acc, *,
                   tail_cols):
    """Online-LSE cross-entropy partial sum for one row tile.

    grid = (num_row_tiles, num_vocab_tiles); row axis "parallel", vocab axis
    "arbitrary".  logits_ref: (TM, TV); tgt_ref: (TM, 1) f32 pre-gathered
    target logits; labels_ref: (TM, 1) int32 (IGNORE_INDEX marks masked rows).
    sum_ref: (1, 1) per-row-tile partial NLL sum, written once in the epilogue.
    """
    v = pl.program_id(1)
    nv = pl.num_programs(1)

    @pl.when(v == 0)
    def _():
        m_acc[...] = jnp.full_like(m_acc, -jnp.inf)
        s_acc[...] = jnp.zeros_like(s_acc)

    x = logits_ref[...].astype(jnp.float32)                 # (TM, TV)

    if tail_cols is not None:
        # Static-only path: V is not a multiple of the vocab tile, so the last
        # vocab block reads past the array; force those columns to -inf.
        col = jax.lax.broadcasted_iota(jnp.int32, x.shape, 1)
        limit = jnp.where(v == nv - 1, tail_cols, x.shape[1])
        x = jnp.where(col < limit, x, -jnp.inf)

    # Online log-sum-exp carry (per-row, independent rows).
    m_blk = jnp.max(x, axis=-1, keepdims=True)               # (TM, 1)
    m_new = jnp.maximum(m_acc[...], m_blk)
    s_acc[...] = (s_acc[...] * jnp.exp(m_acc[...] - m_new)
                  + jnp.sum(jnp.exp(x - m_new), axis=-1, keepdims=True))
    m_acc[...] = m_new

    @pl.when(v == nv - 1)
    def _():
        labels = labels_ref[...]                              # (TM, 1) int32
        valid = labels != IGNORE_INDEX
        lse = m_acc[...] + jnp.log(s_acc[...])
        # True select: Inf/NaN from ragged/garbage rows cannot leak.
        nll = jnp.where(valid, lse - tgt_ref[...], 0.0)
        sum_ref[...] = jnp.sum(nll).reshape(1, 1)


def _tpu_vmem_bytes() -> int:
    """Physical per-core VMEM, with a device_kind fallback so 128 MiB parts
    (v5e/v6e) are never silently treated as 64 MiB."""
    try:
        info = pltpu.get_tpu_info()
        for attr in ("vmem_capacity_bytes", "vmem_size_bytes", "vmem_bytes",
                     "vmem_capacity", "vmem_size"):
            val = getattr(info, attr, None)
            if isinstance(val, (int, float)) and val > 0:
                return int(val)
    except Exception:
        pass
    try:
        kind = jax.devices()[0].device_kind.lower()
        if "v7" in kind:
            return 64 * 1024 * 1024
        if "v5" in kind or "v6" in kind:
            return 128 * 1024 * 1024
    except Exception:
        pass
    return 64 * 1024 * 1024  # conservative default (v7x per-TC)


def _pick_tiles(n_rows: int, vocab: int, itemsize: int, vmem_budget: int):
    """Choose (row_tile, vocab_tile).

    Working-set model per element of the active tile: 2x double-buffered HBM
    input + ~2 live f32 vector temporaries (Mosaic streams the elementwise
    chain through vregs; full intermediates are not materialized).
    """
    row_mult = 8 if itemsize >= 4 else 16
    per_elem = 2 * itemsize + 2 * 4

    def rows_for(vt):
        r = int(vmem_budget // (per_elem * max(vt, 1)))
        r = (r // row_mult) * row_mult
        return max(row_mult, min(r, 2048))

    target_rows = 256
    if vocab <= 4096 or rows_for(vocab) >= target_rows:
        vocab_tile = vocab                      # single vocab tile, no carry
    else:
        # Stream the vocab.  Prefer the largest lane-aligned tile that divides
        # V exactly (no masked tail); otherwise take the cap and mask the tail.
        cap = int(vmem_budget // (per_elem * target_rows))
        cap = max(128, (cap // 128) * 128)
        cap = min(cap, (vocab // 128) * 128)
        vocab_tile = None
        vt = cap
        while vt >= 128:
            if vocab % vt == 0:
                vocab_tile = vt
                break
            vt -= 128
        if vocab_tile is None:
            vocab_tile = cap                    # ragged tail -> in-kernel mask

    row_tile = rows_for(vocab_tile)
    needed = ((max(n_rows, 1) + row_mult - 1) // row_mult) * row_mult
    row_tile = min(row_tile, needed)
    row_tile = max(row_mult, (row_tile // row_mult) * row_mult)
    return row_tile, vocab_tile


@functools.partial(jax.jit, static_argnames=("vocab_size", "loss_gen_type",
                                             "loss_gen_factor"))
def next_token_loss(logits, labels, *, vocab_size, loss_gen_type="mixed",
                    loss_gen_factor=1.0):
    """JAX/Pallas equivalent of NextTokenLoss.forward."""
    if loss_gen_type not in ("mixed", "token"):
        raise ValueError(f"Invalid loss_gen_type: {loss_gen_type}")
    assert logits.shape[-1] == vocab_size
    B, S = labels.shape[0], labels.shape[1]
    n_rows = B * S
    itemsize = jnp.dtype(logits.dtype).itemsize

    # --- VMEM budget, consistent between the tile picker and the scoped limit.
    vmem_phys = _tpu_vmem_bytes()
    vmem_budget = min(int(vmem_phys * 0.75), vmem_phys - (12 << 20))
    row_tile, vocab_tile = _pick_tiles(n_rows, vocab_size, itemsize, vmem_budget)
    vmem_limit = int(min(int(vmem_phys * 0.85), vmem_budget + (4 << 20)))

    num_row_tiles = pl.cdiv(n_rows, row_tile)
    num_vocab_tiles = pl.cdiv(vocab_size, vocab_tile)
    rows_pad = num_row_tiles * row_tile
    tail = vocab_size - (num_vocab_tiles - 1) * vocab_tile
    tail_cols = None if tail == vocab_tile else tail

    # --- Tiny label-side preprocessing (no logits copies).
    # Flattened row r = b*S + s targets labels[b, s+1]; the last position of
    # each sequence (and any padded tail rows) gets IGNORE_INDEX.
    labels_i32 = labels.astype(jnp.int32)
    labels_next = jnp.concatenate(
        [labels_i32[:, 1:], jnp.full((B, 1), IGNORE_INDEX, jnp.int32)], axis=1)
    labels_flat = labels_next.reshape(n_rows)
    valid_flat = labels_flat != IGNORE_INDEX

    # Gather the target logits in the wrapper: an XLA gather of B*S scalars
    # from HBM (the reshape below is a free bitcast, no sliced logits copy).
    logits_2d = logits.reshape(n_rows, vocab_size)
    safe_idx = jnp.clip(jnp.where(valid_flat, labels_flat, 0), 0, vocab_size - 1)
    tgt_flat = jnp.take_along_axis(logits_2d, safe_idx[:, None],
                                   axis=-1).astype(jnp.float32)      # (n_rows, 1)

    pad = rows_pad - n_rows
    labels_prep = jnp.pad(labels_flat, (0, pad),
                          constant_values=IGNORE_INDEX).reshape(rows_pad, 1)
    tgt_prep = jnp.pad(tgt_flat, ((0, pad), (0, 0))).reshape(rows_pad, 1)

    kernel = functools.partial(_ce_lse_kernel, tail_cols=tail_cols)

    sum_part = pl.pallas_call(
        kernel,
        out_shape=jax.ShapeDtypeStruct((num_row_tiles, 1), jnp.float32),
        grid_spec=pltpu.PrefetchScalarGridSpec(
            num_scalar_prefetch=0,
            grid=(num_row_tiles, num_vocab_tiles),
            in_specs=[
                # Original logits bytes, streamed as (row_tile, vocab_tile).
                pl.BlockSpec((row_tile, vocab_tile), lambda r, v: (r, v)),
                # Tiny side inputs, constant along the vocab axis (no re-DMA).
                pl.BlockSpec((row_tile, 1), lambda r, v: (r, 0)),
                pl.BlockSpec((row_tile, 1), lambda r, v: (r, 0)),
            ],
            out_specs=pl.BlockSpec((1, 1), lambda r, v: (r, 0)),
            scratch_shapes=[pltpu.VMEM((row_tile, 1), jnp.float32),   # run max
                            pltpu.VMEM((row_tile, 1), jnp.float32)],  # run sumexp
        ),
        compiler_params=pltpu.CompilerParams(
            dimension_semantics=("parallel", "arbitrary"),
            vmem_limit_bytes=vmem_limit),
    )(logits_2d, tgt_prep, labels_prep)

    loss_sum = jnp.sum(sum_part)
    valid_cnt = jnp.sum(valid_flat.astype(jnp.float32))

    if loss_gen_type == "token":
        loss = loss_sum / jnp.float32(B)          # reduction='sum' / batch
    else:  # "mixed"
        loss = loss_sum / valid_cnt               # reduction='mean' over valid

    # TODO(synk): PyTorch CrossEntropyLoss raises on out-of-range class ids;
    # here such labels are clamped (their loss uses class 0) with no guard.
    return loss * jnp.float32(loss_gen_factor)


def _reference(logits, labels, *, vocab_size, loss_gen_type, loss_gen_factor):
    """Pure-JAX reference mirroring torch.nn.CrossEntropyLoss semantics."""
    sl = logits[..., :-1, :].reshape(-1, vocab_size).astype(jnp.float32)
    tl = labels[..., 1:].reshape(-1)
    valid = tl != IGNORE_INDEX
    safe_t = jnp.where(valid, tl, 0)
    lse = jax.scipy.special.logsumexp(sl, axis=-1)
    nll = lse - jnp.take_along_axis(sl, safe_t[:, None], axis=-1)[:, 0]
    nll = jnp.where(valid, nll, 0.0)
    if loss_gen_type == "token":
        loss = jnp.sum(nll) / labels.shape[0]
    else:
        loss = jnp.sum(nll) / jnp.sum(valid)
    return loss * loss_gen_factor


if __name__ == "__main__":
    key = jax.random.PRNGKey(0)
    B, S, V = 2, 8, 128   # (batch, seq, vocab)
    k1, k2 = jax.random.split(key)
    logits = jax.random.normal(k1, (B, S, V), dtype=jnp.float32)
    labels = jax.random.randint(k2, (B, S), 0, V, dtype=jnp.int32)
    labels = labels.at[0, 3].set(IGNORE_INDEX)   # exercise ignore_index masking

    ok = True
    for loss_type in ("mixed", "token"):
        out = next_token_loss(logits, labels, vocab_size=V,
                              loss_gen_type=loss_type, loss_gen_factor=1.0)
        out = jax.block_until_ready(out)
        ref = _reference(logits, labels, vocab_size=V,
                         loss_gen_type=loss_type, loss_gen_factor=1.0)
        if not jnp.allclose(out, ref, rtol=1e-5, atol=1e-5):
            ok = False
            print(f"MISMATCH ({loss_type}): pallas={out} ref={ref}")

    if ok:
        print("KERNEL_OK")
</pallas_src>

<mosaic_0001>
module attributes {stable_mosaic.version = 11 : i64} {
  func.func @_ce_lse_kernel(%arg0: i32, %arg1: i32, %arg2: memref<16x128xf32, #tpu.memory_space<vmem>>, %arg3: memref<16x1xf32, #tpu.memory_space<vmem>>, %arg4: memref<16x1xi32, #tpu.memory_space<vmem>>, %arg5: memref<1x1xf32, #tpu.memory_space<vmem>>, %arg6: memref<16x1xf32, #tpu.memory_space<vmem>>, %arg7: memref<16x1xf32, #tpu.memory_space<vmem>>) attributes {dimension_semantics = [#tpu.dimension_semantics<parallel>, #tpu.dimension_semantics<arbitrary>], iteration_bounds = array<i64: 1, 1>, scalar_prefetch = 0 : i64, scratch_operands = 2 : i64, tpu.core_type = #tpu.core_type<tc>, window_params = [{transform_indices = @transform_0, window_bounds = array<i64: 16, 128>}, {transform_indices = @transform_1, window_bounds = array<i64: 16, 1>}, {transform_indices = @transform_2, window_bounds = array<i64: 16, 1>}, {transform_indices = @transform_3, window_bounds = array<i64: 1, 1>}]} {
    %c0_i32 = arith.constant 0 : i32
    %0 = arith.cmpi eq, %arg1, %c0_i32 : i32
    %1 = arith.extui %0 : i1 to i32
    %c0_i32_0 = arith.constant 0 : i32
    %2 = arith.cmpi ne, %1, %c0_i32_0 : i32
    scf.if %2 {
      %cst_15 = arith.constant 0xFF800000 : f32
      %24 = vector.broadcast %cst_15 : f32 to vector<16x1xf32>
      %c0_16 = arith.constant 0 : index
      %c0_17 = arith.constant 0 : index
      %25 = vector.load %arg6[%c0_16, %c0_17] : memref<16x1xf32, #tpu.memory_space<vmem>>, vector<16x1xf32>
      tpu.vector_store %arg6[%c0_16, %c0_17], %24 {strides = array<i32>} : memref<16x1xf32, #tpu.memory_space<vmem>>, vector<16x1xf32>,
      %cst_18 = arith.constant 0.000000e+00 : f32
      %26 = vector.broadcast %cst_18 : f32 to vector<16x1xf32>
      %c0_19 = arith.constant 0 : index
      %c0_20 = arith.constant 0 : index
      %27 = vector.load %arg7[%c0_19, %c0_20] : memref<16x1xf32, #tpu.memory_space<vmem>>, vector<16x1xf32>
      tpu.vector_store %arg7[%c0_19, %c0_20], %26 {strides = array<i32>} : memref<16x1xf32, #tpu.memory_space<vmem>>, vector<16x1xf32>,
    } else {
    }
    %c0 = arith.constant 0 : index
    %c0_1 = arith.constant 0 : index
    %3 = vector.load %arg2[%c0, %c0_1] : memref<16x128xf32, #tpu.memory_space<vmem>>, vector<16x128xf32>
    %cst = arith.constant dense<0xFF800000> : vector<16xf32>
    %4 = vector.multi_reduction <maximumf>, %3, %cst [1] : vector<16x128xf32> to vector<16xf32>
    %5 = vector.shape_cast %4 : vector<16xf32> to vector<16x1xf32>
    %c0_2 = arith.constant 0 : index
    %c0_3 = arith.constant 0 : index
    %6 = vector.load %arg6[%c0_2, %c0_3] : memref<16x1xf32, #tpu.memory_space<vmem>>, vector<16x1xf32>
    %7 = arith.maximumf %6, %5 : vector<16x1xf32>
    %c0_4 = arith.constant 0 : index
    %c0_5 = arith.constant 0 : index
    %8 = vector.load %arg7[%c0_4, %c0_5] : memref<16x1xf32, #tpu.memory_space<vmem>>, vector<16x1xf32>
    %c0_6 = arith.constant 0 : index
    %c0_7 = arith.constant 0 : index
    %9 = vector.load %arg6[%c0_6, %c0_7] : memref<16x1xf32, #tpu.memory_space<vmem>>, vector<16x1xf32>
    %10 = arith.subf %9, %7 : vector<16x1xf32>
    %11 = math.exp %10 : vector<16x1xf32>
    %12 = arith.mulf %8, %11 : vector<16x1xf32>
    %13 = vector.broadcast %7 : vector<16x1xf32> to vector<16x128xf32>
    %14 = arith.subf %3, %13 : vector<16x128xf32>
    %15 = math.exp %14 : vector<16x128xf32>
    %cst_8 = arith.constant dense<0.000000e+00> : vector<16xf32>
    %16 = vector.multi_reduction <add>, %15, %cst_8 [1] : vector<16x128xf32> to vector<16xf32>
    %17 = vector.shape_cast %16 : vector<16xf32> to vector<16x1xf32>
    %18 = arith.addf %12, %17 : vector<16x1xf32>
    %c0_9 = arith.constant 0 : index
    %c0_10 = arith.constant 0 : index
    %19 = vector.load %arg7[%c0_9, %c0_10] : memref<16x1xf32, #tpu.memory_space<vmem>>, vector<16x1xf32>
    tpu.vector_store %arg7[%c0_9, %c0_10], %18 {strides = array<i32>} : memref<16x1xf32, #tpu.memory_space<vmem>>, vector<16x1xf32>,
    %c0_11 = arith.constant 0 : index
    %c0_12 = arith.constant 0 : index
    %20 = vector.load %arg6[%c0_11, %c0_12] : memref<16x1xf32, #tpu.memory_space<vmem>>, vector<16x1xf32>
    tpu.vector_store %arg6[%c0_11, %c0_12], %7 {strides = array<i32>} : memref<16x1xf32, #tpu.memory_space<vmem>>, vector<16x1xf32>,
    %c0_i32_13 = arith.constant 0 : i32
    %21 = arith.cmpi eq, %arg1, %c0_i32_13 : i32
    %22 = arith.extui %21 : i1 to i32
    %c0_i32_14 = arith.constant 0 : i32
    %23 = arith.cmpi ne, %22, %c0_i32_14 : i32
    scf.if %23 {
      %c0_15 = arith.constant 0 : index
      %c0_16 = arith.constant 0 : index
      %24 = vector.load %arg4[%c0_15, %c0_16] : memref<16x1xi32, #tpu.memory_space<vmem>>, vector<16x1xi32>
      %c-100_i32 = arith.constant -100 : i32
      %25 = vector.broadcast %c-100_i32 : i32 to vector<16x1xi32>
      %26 = arith.cmpi ne, %24, %25 : vector<16x1xi32>
      %c0_17 = arith.constant 0 : index
      %c0_18 = arith.constant 0 : index
      %27 = vector.load %arg6[%c0_17, %c0_18] : memref<16x1xf32, #tpu.memory_space<vmem>>, vector<16x1xf32>
      %c0_19 = arith.constant 0 : index
      %c0_20 = arith.constant 0 : index
      %28 = vector.load %arg7[%c0_19, %c0_20] : memref<16x1xf32, #tpu.memory_space<vmem>>, vector<16x1xf32>
      %29 = math.log %28 : vector<16x1xf32>
      %30 = arith.addf %27, %29 : vector<16x1xf32>
      %c0_21 = arith.constant 0 : index
      %c0_22 = arith.constant 0 : index
      %31 = vector.load %arg3[%c0_21, %c0_22] : memref<16x1xf32, #tpu.memory_space<vmem>>, vector<16x1xf32>
      %32 = arith.subf %30, %31 : vector<16x1xf32>
      %cst_23 = arith.constant 0.000000e+00 : f32
      %33 = vector.broadcast %cst_23 : f32 to vector<16x1xf32>
      %34 = arith.select %26, %32, %33 : vector<16x1xi1>, vector<16x1xf32>
      %35 = vector.shape_cast %34 : vector<16x1xf32> to vector<1x16x1xf32>
      %cst_24 = arith.constant dense<0.000000e+00> : vector<1xf32>
      %36 = vector.multi_reduction <add>, %35, %cst_24 [1, 2] : vector<1x16x1xf32> to vector<1xf32>
      %37 = vector.shape_cast %36 : vector<1xf32> to vector<1x1x1xf32>
      %38 = vector.extract %37[0, 0, 0] : f32 from vector<1x1x1xf32>
      %39 = vector.broadcast %38 : f32 to vector<1x1xf32>
      %c0_25 = arith.constant 0 : index
      %c0_26 = arith.constant 0 : index
      %40 = vector.load %arg5[%c0_25, %c0_26] : memref<1x1xf32, #tpu.memory_space<vmem>>, vector<1x1xf32>
      tpu.vector_store %arg5[%c0_25, %c0_26], %39 {strides = array<i32>} : memref<1x1xf32, #tpu.memory_space<vmem>>, vector<1x1xf32>,
    } else {
    }
    return
  }
  func.func @transform_0(%arg0: i32, %arg1: i32) -> (i32, i32) {
    %c0_i32 = arith.constant 0 : i32
    return %arg0, %arg1 : i32, i32
  }
  func.func @transform_1(%arg0: i32, %arg1: i32) -> (i32, i32) {
    %c0_i32 = arith.constant 0 : i32
    %c0_i32_0 = arith.constant 0 : i32
    return %arg0, %c0_i32 : i32, i32
  }
  func.func @transform_2(%arg0: i32, %arg1: i32) -> (i32, i32) {
    %c0_i32 = arith.constant 0 : i32
    %c0_i32_0 = arith.constant 0 : i32
    return %arg0, %c0_i32 : i32, i32
  }
  func.func @transform_3(%arg0: i32, %arg1: i32) -> (i32, i32) {
    %c0_i32 = arith.constant 0 : i32
    %c0_i32_0 = arith.constant 0 : i32
    return %arg0, %c0_i32 : i32, i32
  }
}

</mosaic_0001>

<bundles_post_ra>
// kernel: next_token_loss.1
= control target key start
LH: loop header
LB: loop body
LE: loop exit
PB: predicated region body
PF: predicated region fallthrough
CT: control target
= control target key end

     0   :  { %s226_s0 = inlined_call_operand.vmem [shape: f32[16,128], index: 0, kind: input, shape index: {}]   ;;  %s227_s1 = inlined_call_operand.vmem [shape: f32[16,1], index: 1, kind: input, shape index: {}]   ;;  %s228_s2 = inlined_call_operand.vmem [shape: s32[16,1], index: 2, kind: input, shape index: {}]   ;;  %s229_s3 = inlined_call_operand.hbm [shape: f32[1,1], index: 3, kind: output, shape index: {}]  }
   0x1   :  { %v24_v0 = vld [vmem:[%s226_s0] sm:$0xff] }
   0x2   :  { %8 = vsyncpa [#allocation5], 0  ;;  %26 = vmax.xlane.f32.xlu0 %v24_v0  ;;  %v25_v1 = vld [vmem:[%s226_s0 + $0x8] sm:$0xff]  ;;  %vm19_vm0 = vcmask 7168   ;;  %v171_v2 = vmov -inf   ;;  %v172_v3 = vmov 0  }
   0x3   :  { %20 = vst.msk [vmem:[#allocation2] sm:$0xff] %vm19_vm0, %v171_v2  ;;  %131 = vset.pattern.permute.xlu1 %v172_v3  ;;  %132 = vset.pattern.permute.xlu0 %v172_v3  ;;  %v173_v4 = vmov 0.0   ;;  %v88_v39 = vld [vmem:[%s227_s1] sm:$0xff]  ;;  %v75_v42 = vld [vmem:[%s228_s2 + $0x8] sm:$0xff]  ;;  %s116_s25 = sshll.u32 %s229_s3, 4  ;;  %vm107_vm3 = vcmask 0   ;;  %s117_s25 = int_to_ptr.hbm [resolvable:$true] %s116_s25 }
   0x4   :  { %21 = vst.msk [vmem:[#allocation2 + $0x8] sm:$0xff] %vm19_vm0, %v171_v2  ;;  %v74_v40 = vld [vmem:[%s228_s2] sm:$0xff]  ;;  %v89_v46 = vld [vmem:[%s227_s1 + $0x8] sm:$0xff]  ;;  %vm77_vm2 = vcmp.ne.s32.totalorder %v75_v42, 4294967196  ;;  %s174_s1 = smov [#allocation4]  }
   0x5   :  { %22 = vst.msk [vmem:[#allocation3] sm:$0xff] %vm19_vm0, %v173_v4  ;;  %vm76_vm1 = vcmp.ne.s32.totalorder %v74_v40, 4294967196  ;;  %s114_s2 = sshll.u32 %s174_s1, 4  ;;  %s115_s2 = int_to_ptr.vmem [resolvable:$true] %s114_s2 }
   0x6   :  { %23 = vst.msk [vmem:[#allocation3 + $0x8] sm:$0xff] %vm19_vm0, %v173_v4 }
   0xa   :  { %28 = vmax.xlane.f32.xlu0 %v25_v1  ;;  %v30_v5 = vld [vmem:[#allocation2] sm:$0xff] }
   0xb   :  { %v31_v9 = vld [vmem:[#allocation2 + $0x8] sm:$0xff] }
   0xc   :  { %v34_v24 = vld [vmem:[#allocation3] sm:$0xff] }
   0xd   :  { %v35_v29 = vld [vmem:[#allocation3 + $0x8] sm:$0xff] }
  0x75   :  { %v27_v6 = vpop.xlane.xlu0 %26 }
  0x76   :  { %v32_v7 = vmax.f32 %v30_v5, %v27_v6 }
  0x78   :  { %v36_v8 = vsub.f32 %v30_v5, %v32_v7  ;;  %69 = vst.msk [vmem:[#allocation2] sm:$0xff] %vm19_vm0, %v32_v7  ;;  %46 = vperm.xlu1 %131, %v32_v7  }
  0x7a   :  { %v38_v21 = vmul.f32 1.442695, %v36_v8 }
  0x7d   :  { %v29_v10 = vpop.xlane.xlu0 %28 }
  0x7e   :  { %v33_v11 = vmax.f32 %v31_v9, %v29_v10 }
  0x7f   :  { %v78_v37 = vld [vmem:[#allocation2] sm:$0xff] }
  0x80   :  { %v37_v12 = vsub.f32 %v31_v9, %v33_v11  ;;  %70 = vst.msk [vmem:[#allocation2 + $0x8] sm:$0xff] %vm19_vm0, %v33_v11  ;;  %51 = vperm.xlu1 %131, %v33_v11  }
  0x82   :  { %v40_v22 = vmul.f32 1.442695, %v37_v12 }
  0x87   :  { %v79_v45 = vld [vmem:[#allocation2 + $0x8] sm:$0xff] }
  0xea   :  { %v47_v13 = vpop.permute.xlu1 %46 }
  0xeb   :  { %v54_v14 = vsub.f32 %v24_v0, %v47_v13 }
  0xed   :  { %v56_v15 = vmul.f32 1.442695, %v54_v14 }
  0xef   :  { %133 = vpow2.f32 %v56_v15 }
  0xf2   :  { %v52_v16 = vpop.permute.xlu1 %51 }
  0xf3   :  { %v55_v17 = vsub.f32 %v25_v1, %v52_v16 }
  0xf5   :  { %v134_v18 = vpop.eup %133  ;;  %v58_v19 = vmul.f32 1.442695, %v55_v17 }
  0xf6   :  { %60 = vadd.xlane.f32.xlu2 %v134_v18 }
  0xf7   :  { %135 = vpow2.f32 %v58_v19 }
  0xf8   :  { %137 = vpow2.f32 %v38_v21 }
  0xf9   :  { %139 = vpow2.f32 %v40_v22 }
  0xfd   :  { %v136_v20 = vpop.eup %135 }
  0xfe   :  { %62 = vadd.xlane.f32.xlu2 %v136_v20  ;;  %v138_v23 = vpop.eup %137 }
  0xff   :  { %v42_v25 = vmul.f32 %v138_v23, %v34_v24  ;;  %v140_v28 = vpop.eup %139 }
 0x100   :  { %v43_v30 = vmul.f32 %v140_v28, %v35_v29 }
 0x169   :  { %v61_v26 = vpop.xlane.xlu2 %60 }
 0x16a   :  { %v64_v27 = vadd.f32 %v61_v26, %v42_v25 }
 0x16c   :  { %67 = vst.msk [vmem:[#allocation3] sm:$0xff] %vm19_vm0, %v64_v27 }
 0x171   :  { %v63_v31 = vpop.xlane.xlu2 %62 }
 0x172   :  { %v65_v32 = vadd.f32 %v63_v31, %v43_v30 }
 0x173   :  { %v80_v33 = vld [vmem:[#allocation3] sm:$0xff] }
 0x174   :  { %68 = vst.msk [vmem:[#allocation3 + $0x8] sm:$0xff] %vm19_vm0, %v65_v32  ;;  %141 = vlog2.f32 %v80_v33 }
 0x17a   :  { %v142_v34 = vpop.eup %141 }
 0x17b   :  { %v81_v35 = vld [vmem:[#allocation3 + $0x8] sm:$0xff]  ;;  %v83_v36 = vmul.f32 0.6931472, %v142_v34 }
 0x17c   :  { %143 = vlog2.f32 %v81_v35 }
 0x17d   :  { %v86_v38 = vadd.f32 %v83_v36, %v78_v37 }
 0x17f   :  { %v90_v44 = vsub.f32 %v86_v38, %v88_v39 }
 0x181   :  { %v92_v49 = vsel %vm76_vm1, %v90_v44, 0.0 }
 0x182   :  { %v144_v41 = vpop.eup %143  ;;  %v94_v51 = vsel %vm19_vm0, %v92_v49, 0.0 }
 0x183   :  { %v85_v43 = vmul.f32 0.6931472, %v144_v41 }
 0x185   :  { %v87_v47 = vadd.f32 %v85_v43, %v79_v45 }
 0x187   :  { %v91_v48 = vsub.f32 %v87_v47, %v89_v46 }
 0x189   :  { %v93_v50 = vsel %vm77_vm2, %v91_v48, 0.0 }
 0x18a   :  { %v95_v52 = vsel %vm19_vm0, %v93_v50, 0.0 }
 0x18b   :  { %v96_v53 = vadd.f32 %v95_v52, %v94_v51 }
 0x18d   :  { %97 = vadd.xlane.f32.xlu0 %v96_v53 }
 0x200   :  { %v98_v54 = vpop.xlane.xlu0 %97 }
 0x201   :  { %v99_v55 = vrot.slane %v98_v54, 4 }
 0x203   :  { %v100_v56 = vadd.f32 %v99_v55, %v98_v54 }
 0x205   :  { %v101_v57 = vrot.slane %v100_v56, 2 }
 0x207   :  { %v102_v58 = vadd.f32 %v101_v57, %v100_v56 }
 0x209   :  { %v103_v59 = vrot.slane %v102_v58, 1 }
 0x20b   :  { %v104_v60 = vadd.f32 %v103_v59, %v102_v58 }
 0x20d   :  { %125 = vpush %v104_v60 }
 0x23e   :  { %s126_s26 = spop %125 }
 0x23f   :  { %v106_v61 = vstv %s126_s26 }
 0x240   :  { %108 = vst.msk [vmem:[#allocation4] sm:$0x1] %vm107_vm3, %v106_v61 }
 0x241   :  { %119 = dma.vmem_to_hbm [thread:$0]  %s115_s2, 16, %s117_s25, [#allocation5]  }
 0x242   :  { %169 = dma.done.wait [#allocation5], 16  }
 0x243   :  { %170 = vsyncadd [#allocation5], 4294967280 }
 0x244   :  { %124 = vsyncpa [#allocation5], 1 }

</bundles_post_ra>
